<compile_context>
chip_gen: v7x
topology: tpu7x:2x2x1
jax: 0.10.0
libtpu: 0.0.40
codegen_flags: <defaults>
</compile_context>

<pallas_src>
import numpy as np
import jax
import jax.numpy as jnp
from jax.experimental import pallas as pl
from jax.experimental.pallas import tpu as pltpu

# --- small, consistent hyper-parameters -------------------------------------
NUM_CLASS = 5          # reference decode's .view([B, P, nsc, 3]) only
                       # shape-checks when num_class == 5 (see slicing math)
NHB = 4                # num heading bins
NSC = 4                # num size clusters
PROP_NUM = 16
FEAT_DIM = 128
C_OUT = 2 + 3 + NHB * 2 + NSC * 4 + NUM_CLASS   # = 34 output channels of c3
C_PAD = 128            # lane-dense (padded) output width for the kernel store
BN_EPS = 1e-5
MXU_DTYPE = jnp.bfloat16   # MXU-input dtype; accumulation / bias / ReLU are f32

# Channel layout of the decode (mirrors the PyTorch slicing, incl. its clipping
# at C_OUT), plus the extra "fused decode" lanes produced by the extended c3.
NHBS = 5 + NHB                              # 9
NHBNSC = 2 * NHBS + NSC                     # 22
HR_LO, HR_HI = NHBS, min(2 * NHBS, C_OUT)   # [9, 18)   h_res_norm channels
SR_LO, SR_HI = NHBNSC, min(4 * NHBNSC, C_OUT)  # [22, 34) s_res_norm channels
CENTER_OFF = C_OUT                          # 34: 3 lanes  = net[2:5] (xyz added outside)
HRES_OFF = CENTER_OFF + 3                   # 37: 9 lanes  = net[9:18] * pi/nhb
SRES_OFF = HRES_OFF + (HR_HI - HR_LO)       # 46: 12 lanes = net[22:34] * mean_flat
C_USED = SRES_OFF + (SR_HI - SR_LO)         # 58 (rest of the 128 lanes is zero)


# --- Pallas kernel: fused conv1(k=1)+bn1+relu -> conv2+bn2+relu -> conv3 -----
def _proposal_head_kernel(x_ref, w1_ref, b1_ref, w2_ref, b2_ref, w3_ref, b3_ref,
                          out_ref):
    x = x_ref[...].astype(MXU_DTYPE)                                  # f32 -> bf16 on VPU (free)
    h = jnp.dot(x, w1_ref[...], preferred_element_type=jnp.float32) + b1_ref[...]
    h = jnp.maximum(h, 0.0).astype(MXU_DTYPE)                         # ReLU(BN(c1))
    h = jnp.dot(h, w2_ref[...], preferred_element_type=jnp.float32) + b2_ref[...]
    h = jnp.maximum(h, 0.0).astype(MXU_DTYPE)                         # ReLU(BN(c2))
    net = jnp.dot(h, w3_ref[...], preferred_element_type=jnp.float32) + b3_ref[...]
    out_ref[...] = net.astype(out_ref.dtype)                          # (TM, 128) bf16, lane-dense


def _round_up(x, m):
    return -(-x // m) * m


def _choose_tiling(M):
    """Row tiling of the flattened B*P axis.

    Prefer no-pad tiles; keep TM <= 1024 (amortizes the ~0.35us per-step
    pipeline overhead); give >= 2 "parallel" steps for larger M so v7x's
    second TensorCore is used.  Returns (TM, M_pad).
    """
    if M <= 512 or (M <= 1024 and M % 16 != 0):
        return M, M                            # single full block (latency-bound), no pad
    n_steps = max(2, -(-M // 1024))            # >= 2 steps for megacore sharding
    tm = _round_up(-(-M // n_steps), 8)
    return tm, tm * n_steps                    # usually M_pad == M (no pad copy)


def proposal_head(x_cl, w1t, b1, w2t, b2, w3e_pad, b3e_pad):
    """x_cl: (B, P, 128) channels-last aggregated features (f32).

    Returns the lane-padded, decode-extended head output (B, P, C_PAD) bf16:
    lanes [0:C_OUT] are net^T, lanes [C_OUT:C_USED] are the fused decode lanes.
    """
    B, P, C = x_cl.shape
    M = B * P
    x_flat = x_cl.reshape(M, C)                # f32; cast to bf16 happens in-kernel

    TM, M_pad = _choose_tiling(M)
    if M_pad != M:
        # TODO(synk): ragged-tail masked tile would avoid this copy; rare case.
        x_flat = jnp.pad(x_flat, ((0, M_pad - M), (0, 0)))
    grid = (M_pad // TM,)

    out = pl.pallas_call(
        _proposal_head_kernel,
        out_shape=jax.ShapeDtypeStruct((M_pad, C_PAD), jnp.bfloat16),
        grid_spec=pltpu.PrefetchScalarGridSpec(
            num_scalar_prefetch=0,
            grid=grid,
            in_specs=[
                pl.BlockSpec((TM, FEAT_DIM), lambda i: (i, 0)),
                pl.BlockSpec((FEAT_DIM, FEAT_DIM), lambda i: (0, 0)),
                pl.BlockSpec((1, FEAT_DIM), lambda i: (0, 0)),
                pl.BlockSpec((FEAT_DIM, FEAT_DIM), lambda i: (0, 0)),
                pl.BlockSpec((1, FEAT_DIM), lambda i: (0, 0)),
                pl.BlockSpec((FEAT_DIM, C_PAD), lambda i: (0, 0)),
                pl.BlockSpec((1, C_PAD), lambda i: (0, 0)),
            ],
            out_specs=pl.BlockSpec((TM, C_PAD), lambda i: (i, 0)),
        ),
        compiler_params=pltpu.CompilerParams(dimension_semantics=("parallel",)),
    )(x_flat,
      w1t.astype(MXU_DTYPE), b1,
      w2t.astype(MXU_DTYPE), b2,
      w3e_pad.astype(MXU_DTYPE), b3e_pad)

    if M_pad != M:
        out = out[:M]
    return out.reshape(B, P, C_PAD)


# --- plain-JAX glue ----------------------------------------------------------
def fold_conv_bn(w, b, gamma, beta, rmean, rvar, eps=BN_EPS):
    """Fold eval-mode BatchNorm1d into a k=1 Conv1d. w: (Cout, Cin), b: (Cout,)."""
    s = gamma / jnp.sqrt(rvar + eps)
    return w * s[:, None], b * s + (beta - rmean * s)


def _extend_c3(w3, b3, mean):
    """Build the decode-extended c3: extra output columns compute the linear
    decode terms (center delta, h_res, size_residuals) directly on the MXU."""
    mean_flat = jnp.asarray(np.asarray(mean, np.float32)).reshape(-1)[: SR_HI - SR_LO]
    w3t = w3.T                                             # (128, C_OUT)
    cols = jnp.concatenate([
        w3t,                                               # [0:34)   raw net
        w3t[:, 2:5],                                       # [34:37)  center delta
        w3t[:, HR_LO:HR_HI] * (np.pi / NHB),               # [37:46)  h_res
        w3t[:, SR_LO:SR_HI] * mean_flat[None, :],          # [46:58)  size_residuals
    ], axis=1)
    bias = jnp.concatenate([
        b3,
        b3[2:5],
        b3[HR_LO:HR_HI] * (np.pi / NHB),
        b3[SR_LO:SR_HI] * mean_flat,
    ])
    w_pad = jnp.zeros((FEAT_DIM, C_PAD), jnp.float32).at[:, :C_USED].set(cols)
    b_pad = jnp.zeros((1, C_PAD), jnp.float32).at[0, :C_USED].set(bias)
    return w_pad, b_pad


def head_params_folded(params, mean):
    w1f, b1f = fold_conv_bn(params['c1_w'], params['c1_b'], params['bn1_gamma'],
                            params['bn1_beta'], params['bn1_mean'], params['bn1_var'])
    w2f, b2f = fold_conv_bn(params['c2_w'], params['c2_b'], params['bn2_gamma'],
                            params['bn2_beta'], params['bn2_mean'], params['bn2_var'])
    w3e, b3e = _extend_c3(params['c3_w'], params['c3_b'], mean)
    return (w1f.T, b1f[None, :], w2f.T, b2f[None, :], w3e, b3e)


def decode_scores(net_pad, fin_line):
    """Mirror of atenke_dikodirowanya on the lane-padded kernel output.

    All slice ends are clamped to C_OUT so the reference's channel-clipping
    semantics (including the zero-width sem_cls_scores) are preserved; the
    scaled terms come from the fused decode lanes (pure slicing, no arithmetic).
    """
    B, P, _ = net_pad.shape
    fin_line['o_score'] = net_pad[:, :, 0:2]
    fin_line['center'] = fin_line['aggregated_vote_xyz'] + net_pad[:, :, CENTER_OFF:CENTER_OFF + 3]
    fin_line['h_score'] = net_pad[:, :, 5:NHBS]
    fin_line['h_res_norm'] = net_pad[:, :, HR_LO:HR_HI]
    fin_line['h_res'] = net_pad[:, :, HRES_OFF:HRES_OFF + (HR_HI - HR_LO)]
    fin_line['size_scores'] = net_pad[:, :, 2 * NHBS:NHBNSC]
    fin_line['s_res_norm'] = net_pad[:, :, SR_LO:SR_HI].reshape(B, P, NSC, 3)
    fin_line['size_residuals'] = net_pad[:, :, SRES_OFF:SRES_OFF + (SR_HI - SR_LO)].reshape(B, P, NSC, 3)
    # TODO(synk): reference guards with `if cls_score >= 0:` (python truth-test of a
    # possibly 0-element tensor, ill-defined in PyTorch); we always store it.
    fin_line['sem_cls_scores'] = net_pad[:, :, min(4 * NHBNSC, C_OUT):C_OUT]
    return fin_line


def proposal_module_forward(agg_xyz, agg_features_cl, sample_inds, fin_line, params, mean):
    fin_line['aggregated_vote_xyz'] = agg_xyz
    fin_line['aggregated_vote_inds'] = sample_inds
    net_pad = proposal_head(agg_features_cl, *head_params_folded(params, mean))
    fin_line = decode_scores(net_pad, fin_line)
    return fin_line, net_pad


# --- references (original module semantics, no decode fusion) ----------------
def _plain_folded(params):
    w1f, b1f = fold_conv_bn(params['c1_w'], params['c1_b'], params['bn1_gamma'],
                            params['bn1_beta'], params['bn1_mean'], params['bn1_var'])
    w2f, b2f = fold_conv_bn(params['c2_w'], params['c2_b'], params['bn2_gamma'],
                            params['bn2_beta'], params['bn2_mean'], params['bn2_var'])
    return w1f.T, b1f, w2f.T, b2f, params['c3_w'].T, params['c3_b']


def head_reference_bf16(agg_features_cl, params):
    """Plain-JAX reference with the same bf16-MXU / f32-accumulate / bf16-store numerics."""
    w1t, b1, w2t, b2, w3t, b3 = _plain_folded(params)
    x = agg_features_cl.astype(MXU_DTYPE)
    h = jnp.dot(x, w1t.astype(MXU_DTYPE), preferred_element_type=jnp.float32) + b1
    h = jnp.maximum(h, 0.0).astype(MXU_DTYPE)
    h = jnp.dot(h, w2t.astype(MXU_DTYPE), preferred_element_type=jnp.float32) + b2
    h = jnp.maximum(h, 0.0).astype(MXU_DTYPE)
    net = jnp.dot(h, w3t.astype(MXU_DTYPE), preferred_element_type=jnp.float32) + b3
    return net.astype(MXU_DTYPE)


def head_reference_f32(agg_features_cl, params):
    """Full-f32 reference of the original module semantics."""
    w1t, b1, w2t, b2, w3t, b3 = _plain_folded(params)
    h = jnp.maximum(agg_features_cl @ w1t + b1, 0.0)
    h = jnp.maximum(h @ w2t + b2, 0.0)
    return h @ w3t + b3


def init_params(key):
    ks = jax.random.split(key, 18)
    u = lambda k, shape, s: jax.random.uniform(k, shape, jnp.float32, -s, s)
    n = lambda k, shape: jax.random.normal(k, shape, jnp.float32)
    return {
        'c1_w': u(ks[0], (FEAT_DIM, FEAT_DIM), 0.05),
        'c1_b': u(ks[1], (FEAT_DIM,), 0.05),
        'c2_w': u(ks[2], (FEAT_DIM, FEAT_DIM), 0.05),
        'c2_b': u(ks[3], (FEAT_DIM,), 0.05),
        'c3_w': u(ks[4], (C_OUT, FEAT_DIM), 0.05),
        'c3_b': u(ks[5], (C_OUT,), 0.05),
        'bn1_gamma': 1.0 + 0.1 * n(ks[6], (FEAT_DIM,)),
        'bn1_beta': 0.1 * n(ks[7], (FEAT_DIM,)),
        'bn1_mean': 0.1 * n(ks[8], (FEAT_DIM,)),
        'bn1_var': jnp.abs(1.0 + 0.1 * n(ks[9], (FEAT_DIM,))),
        'bn2_gamma': 1.0 + 0.1 * n(ks[10], (FEAT_DIM,)),
        'bn2_beta': 0.1 * n(ks[11], (FEAT_DIM,)),
        'bn2_mean': 0.1 * n(ks[12], (FEAT_DIM,)),
        'bn2_var': jnp.abs(1.0 + 0.1 * n(ks[13], (FEAT_DIM,))),
    }


if __name__ == "__main__":
    key = jax.random.PRNGKey(0)
    kp, kx, kf, ki = jax.random.split(key, 4)
    params = init_params(kp)

    B = 2
    agg_xyz = jax.random.normal(kx, (B, PROP_NUM, 3), jnp.float32)
    agg_features = jax.random.normal(kf, (B, PROP_NUM, FEAT_DIM), jnp.float32)
    sample_inds = jax.random.randint(ki, (B, PROP_NUM), 0, 64, jnp.int32)
    mean_size_arr = np.linspace(0.3, 2.4, NSC * 3, dtype=np.float32).reshape(NSC, 3)

    fin_line, net_pad = proposal_module_forward(agg_xyz, agg_features, sample_inds,
                                                {}, params, mean_size_arr)
    jax.block_until_ready(fin_line)

    net_t = net_pad[:, :, :C_OUT].astype(jnp.float32)           # test-time slice only
    # sanity check of the Pallas head: same-numerics (bf16 MXU + bf16 store) reference ...
    net_ref = head_reference_bf16(agg_features, params).astype(jnp.float32)
    assert jnp.allclose(net_t, net_ref, atol=1e-2, rtol=1e-2)
    # ... and the original f32 module semantics (loose tol for bf16 MXU inputs/store)
    net_ref32 = head_reference_f32(agg_features, params)
    assert jnp.allclose(net_t, net_ref32, atol=3e-2, rtol=3e-2)

    # fused decode lanes match the reference decode arithmetic
    mean_j = jnp.asarray(mean_size_arr)
    assert jnp.allclose(fin_line['size_residuals'].astype(jnp.float32),
                        net_t[:, :, SR_LO:SR_HI].reshape(B, PROP_NUM, NSC, 3) * mean_j[None, None],
                        atol=2e-2, rtol=2e-2)
    assert jnp.allclose(fin_line['h_res'].astype(jnp.float32),
                        net_t[:, :, HR_LO:HR_HI] * (np.pi / NHB), atol=2e-2, rtol=2e-2)
    assert jnp.allclose(fin_line['center'].astype(jnp.float32),
                        agg_xyz + net_t[:, :, 2:5], atol=2e-2, rtol=2e-2)

    assert fin_line['s_res_norm'].shape == (B, PROP_NUM, NSC, 3)
    assert fin_line['size_residuals'].shape == (B, PROP_NUM, NSC, 3)
    assert fin_line['center'].shape == (B, PROP_NUM, 3)
    assert fin_line['sem_cls_scores'].shape == (B, PROP_NUM, 0)
    assert net_t.shape == (B, PROP_NUM, C_OUT)

    print("KERNEL_OK")
</pallas_src>

<mosaic_0001>
module attributes {stable_mosaic.version = 11 : i64} {
  func.func @_proposal_head_kernel(%arg0: i32, %arg1: memref<32x128xf32, #tpu.memory_space<vmem>>, %arg2: memref<128x128xbf16, #tpu.memory_space<vmem>>, %arg3: memref<1x128xf32, #tpu.memory_space<vmem>>, %arg4: memref<128x128xbf16, #tpu.memory_space<vmem>>, %arg5: memref<1x128xf32, #tpu.memory_space<vmem>>, %arg6: memref<128x128xbf16, #tpu.memory_space<vmem>>, %arg7: memref<1x128xf32, #tpu.memory_space<vmem>>, %arg8: memref<32x128xbf16, #tpu.memory_space<vmem>>) attributes {dimension_semantics = [#tpu.dimension_semantics<parallel>], iteration_bounds = array<i64: 1>, scalar_prefetch = 0 : i64, scratch_operands = 0 : i64, tpu.core_type = #tpu.core_type<tc>, window_params = [{transform_indices = @transform_0, window_bounds = array<i64: 32, 128>}, {pipeline_mode = #tpu.pipeline_mode<synchronous>, transform_indices = @transform_1, window_bounds = array<i64: 128, 128>}, {pipeline_mode = #tpu.pipeline_mode<synchronous>, transform_indices = @transform_2, window_bounds = array<i64: 1, 128>}, {pipeline_mode = #tpu.pipeline_mode<synchronous>, transform_indices = @transform_3, window_bounds = array<i64: 128, 128>}, {pipeline_mode = #tpu.pipeline_mode<synchronous>, transform_indices = @transform_4, window_bounds = array<i64: 1, 128>}, {pipeline_mode = #tpu.pipeline_mode<synchronous>, transform_indices = @transform_5, window_bounds = array<i64: 128, 128>}, {pipeline_mode = #tpu.pipeline_mode<synchronous>, transform_indices = @transform_6, window_bounds = array<i64: 1, 128>}, {transform_indices = @transform_7, window_bounds = array<i64: 32, 128>}]} {
    %c0 = arith.constant 0 : index
    %c0_0 = arith.constant 0 : index
    %0 = vector.load %arg1[%c0, %c0_0] : memref<32x128xf32, #tpu.memory_space<vmem>>, vector<32x128xf32>
    %1 = arith.truncf %0 : vector<32x128xf32> to vector<32x128xbf16>
    %c0_1 = arith.constant 0 : index
    %c0_2 = arith.constant 0 : index
    %2 = vector.load %arg2[%c0_1, %c0_2] : memref<128x128xbf16, #tpu.memory_space<vmem>>, vector<128x128xbf16>
    %cst = arith.constant dense<0.000000e+00> : vector<32x128xf32>
    %3 = tpu.matmul %1, %2, %cst {dimension_numbers = #tpu.dot_dimension_numbers<[1], [0], [0], [1], [0, 0, 1, 1], [], []>} : vector<32x128xbf16>, vector<128x128xbf16>, vector<32x128xf32> -> vector<32x128xf32>
    %c0_3 = arith.constant 0 : index
    %c0_4 = arith.constant 0 : index
    %4 = vector.load %arg3[%c0_3, %c0_4] : memref<1x128xf32, #tpu.memory_space<vmem>>, vector<1x128xf32>
    %5 = vector.broadcast %4 : vector<1x128xf32> to vector<32x128xf32>
    %6 = arith.addf %3, %5 : vector<32x128xf32>
    %cst_5 = arith.constant 0.000000e+00 : f32
    %7 = vector.broadcast %cst_5 : f32 to vector<32x128xf32>
    %8 = arith.maximumf %6, %7 : vector<32x128xf32>
    %9 = arith.truncf %8 : vector<32x128xf32> to vector<32x128xbf16>
    %c0_6 = arith.constant 0 : index
    %c0_7 = arith.constant 0 : index
    %10 = vector.load %arg4[%c0_6, %c0_7] : memref<128x128xbf16, #tpu.memory_space<vmem>>, vector<128x128xbf16>
    %cst_8 = arith.constant dense<0.000000e+00> : vector<32x128xf32>
    %11 = tpu.matmul %9, %10, %cst_8 {dimension_numbers = #tpu.dot_dimension_numbers<[1], [0], [0], [1], [0, 0, 1, 1], [], []>} : vector<32x128xbf16>, vector<128x128xbf16>, vector<32x128xf32> -> vector<32x128xf32>
    %c0_9 = arith.constant 0 : index
    %c0_10 = arith.constant 0 : index
    %12 = vector.load %arg5[%c0_9, %c0_10] : memref<1x128xf32, #tpu.memory_space<vmem>>, vector<1x128xf32>
    %13 = vector.broadcast %12 : vector<1x128xf32> to vector<32x128xf32>
    %14 = arith.addf %11, %13 : vector<32x128xf32>
    %cst_11 = arith.constant 0.000000e+00 : f32
    %15 = vector.broadcast %cst_11 : f32 to vector<32x128xf32>
    %16 = arith.maximumf %14, %15 : vector<32x128xf32>
    %17 = arith.truncf %16 : vector<32x128xf32> to vector<32x128xbf16>
    %c0_12 = arith.constant 0 : index
    %c0_13 = arith.constant 0 : index
    %18 = vector.load %arg6[%c0_12, %c0_13] : memref<128x128xbf16, #tpu.memory_space<vmem>>, vector<128x128xbf16>
    %cst_14 = arith.constant dense<0.000000e+00> : vector<32x128xf32>
    %19 = tpu.matmul %17, %18, %cst_14 {dimension_numbers = #tpu.dot_dimension_numbers<[1], [0], [0], [1], [0, 0, 1, 1], [], []>} : vector<32x128xbf16>, vector<128x128xbf16>, vector<32x128xf32> -> vector<32x128xf32>
    %c0_15 = arith.constant 0 : index
    %c0_16 = arith.constant 0 : index
    %20 = vector.load %arg7[%c0_15, %c0_16] : memref<1x128xf32, #tpu.memory_space<vmem>>, vector<1x128xf32>
    %21 = vector.broadcast %20 : vector<1x128xf32> to vector<32x128xf32>
    %22 = arith.addf %19, %21 : vector<32x128xf32>
    %23 = arith.truncf %22 : vector<32x128xf32> to vector<32x128xbf16>
    %c0_17 = arith.constant 0 : index
    %c0_18 = arith.constant 0 : index
    %24 = vector.load %arg8[%c0_17, %c0_18] : memref<32x128xbf16, #tpu.memory_space<vmem>>, vector<32x128xbf16>
    tpu.vector_store %arg8[%c0_17, %c0_18], %23 {strides = array<i32>} : memref<32x128xbf16, #tpu.memory_space<vmem>>, vector<32x128xbf16>,
    return
  }
  func.func @transform_0(%arg0: i32) -> (i32, i32) {
    %c0_i32 = arith.constant 0 : i32
    %c0_i32_0 = arith.constant 0 : i32
    return %arg0, %c0_i32 : i32, i32
  }
  func.func @transform_1(%arg0: i32) -> (i32, i32) {
    %c0_i32 = arith.constant 0 : i32
    %c0_i32_0 = arith.constant 0 : i32
    %c0_i32_1 = arith.constant 0 : i32
    return %c0_i32, %c0_i32_0 : i32, i32
  }
  func.func @transform_2(%arg0: i32) -> (i32, i32) {
    %c0_i32 = arith.constant 0 : i32
    %c0_i32_0 = arith.constant 0 : i32
    %c0_i32_1 = arith.constant 0 : i32
    return %c0_i32, %c0_i32_0 : i32, i32
  }
  func.func @transform_3(%arg0: i32) -> (i32, i32) {
    %c0_i32 = arith.constant 0 : i32
    %c0_i32_0 = arith.constant 0 : i32
    %c0_i32_1 = arith.constant 0 : i32
    return %c0_i32, %c0_i32_0 : i32, i32
  }
  func.func @transform_4(%arg0: i32) -> (i32, i32) {
    %c0_i32 = arith.constant 0 : i32
    %c0_i32_0 = arith.constant 0 : i32
    %c0_i32_1 = arith.constant 0 : i32
    return %c0_i32, %c0_i32_0 : i32, i32
  }
  func.func @transform_5(%arg0: i32) -> (i32, i32) {
    %c0_i32 = arith.constant 0 : i32
    %c0_i32_0 = arith.constant 0 : i32
    %c0_i32_1 = arith.constant 0 : i32
    return %c0_i32, %c0_i32_0 : i32, i32
  }
  func.func @transform_6(%arg0: i32) -> (i32, i32) {
    %c0_i32 = arith.constant 0 : i32
    %c0_i32_0 = arith.constant 0 : i32
    %c0_i32_1 = arith.constant 0 : i32
    return %c0_i32, %c0_i32_0 : i32, i32
  }
  func.func @transform_7(%arg0: i32) -> (i32, i32) {
    %c0_i32 = arith.constant 0 : i32
    %c0_i32_0 = arith.constant 0 : i32
    return %arg0, %c0_i32 : i32, i32
  }
}

</mosaic_0001>

<bundles_post_ra>
// kernel: tpu_custom_call.1
= control target key start
LH: loop header
LB: loop body
LE: loop exit
PB: predicated region body
PF: predicated region fallthrough
CT: control target
= control target key end

     0   :  { %12 = vsyncpa [#allocation3], 0  ;;  %s924_s0 = inlined_call_operand.hbm [shape: f32[32,128], index: 0, kind: input, shape index: {}]   ;;  %s925_s1 = inlined_call_operand.hbm [shape: bf16[128,128], index: 1, kind: input, shape index: {}]   ;;  %s926_s2 = inlined_call_operand.vmem [shape: f32[1,128], index: 2, kind: input, shape index: {}]   ;;  %s927_s3 = inlined_call_operand.hbm [shape: bf16[128,128], index: 3, kind: input, shape index: {}]   ;;  %s928_s4 = inlined_call_operand.vmem [shape: f32[1,128], index: 4, kind: input, shape index: {}]   ;;  %s929_s5 = inlined_call_operand.hbm [shape: bf16[128,128], index: 5, kind: input, shape index: {}]   ;;  %s930_s6 = inlined_call_operand.vmem [shape: f32[1,128], index: 6, kind: input, shape index: {}]   ;;  %s931_s7 = inlined_call_operand.hbm [shape: bf16[32,128], index: 7, kind: output, shape index: {}]  }
   0x1   :  { %13 = vsyncpa [#allocation6], 0 }
   0x2   :  { %14 = vsyncpa [#allocation9], 0 }
   0x3   :  { %15 = vsyncpa [#allocation4], 0  ;;  %s787_s24 = smov [#allocation5]   ;;  %s669_s28 = scalar_lea.hbm %s925_s1, 1024 }
   0x4   :  { %s33_s25 = sshll.u32 %s787_s24, 4  ;;  %p670_p0 = scmp.ne.s32.totalorder %s925_s1, %s669_s28  ;;  %s34_s25 = int_to_ptr.vmem [resolvable:$true] %s33_s25 }
   0x5   :  { %p673_p1 = scmp.lt.u32.totalorder %s669_s28, %s925_s1 }
   0x7   :  { %p675_p2 = pnand %p673_p1, %p670_p0 }
   0x9   :  { %678 = shalt.err (!%p675_p2)
}
   0xa   :  { %s679_s10 = scalar_lea.vmem %s34_s25, 1024  ;;  %p684_p4 = scmp.lt.s32.totalorder %s34_s25, %s34_s25 }
   0xb   :  { %p680_p3 = scmp.ne.s32.totalorder %s34_s25, %s679_s10  ;;  %p685_p5 = scmp.lt.s32.totalorder %s679_s10, %s679_s10 }
   0xd   :  { %p686_p6 = por %p685_p5, %p684_p4 }
   0xf   :  { %p687_p7 = pnand %p686_p6, %p680_p3 }
  0x11   :  { %690 = shalt.err (!%p687_p7)
}
  0x12   :  { %s788_s11 = smov 64   ;;  %s789_s12 = smov 4  }
  0x13   :  { %39 = dma.hbm_to_vmem [thread:$0]  %s925_s1, 1024, %s34_s25, [#allocation6], %s788_s11, %s788_s11, %s789_s12  }
  0x14   :  { %s790_s15 = smov [#allocation2]   ;;  %s691_s19 = scalar_lea.hbm %s924_s0, 512 }
  0x15   :  { %s21_s16 = sshll.u32 %s790_s15, 4  ;;  %p692_p8 = scmp.ne.s32.totalorder %s924_s0, %s691_s19  ;;  %s22_s16 = int_to_ptr.vmem [resolvable:$true] %s21_s16 }
  0x16   :  { %p695_p9 = scmp.lt.u32.totalorder %s691_s19, %s924_s0 }
  0x18   :  { %p697_p10 = pnand %p695_p9, %p692_p8 }
  0x1a   :  { %700 = shalt.err (!%p697_p10)
}
  0x1b   :  { %s701_s24 = scalar_lea.vmem %s22_s16, 512  ;;  %p706_p12 = scmp.lt.s32.totalorder %s22_s16, %s22_s16 }
  0x1c   :  { %p702_p11 = scmp.ne.s32.totalorder %s22_s16, %s701_s24  ;;  %p707_p13 = scmp.lt.s32.totalorder %s701_s24, %s701_s24 }
  0x1e   :  { %p708_p0 = por %p707_p13, %p706_p12 }
  0x20   :  { %p709_p1 = pnand %p708_p0, %p702_p11 }
  0x22   :  { %712 = shalt.err (!%p709_p1)
}
  0x23   :  { %s791_s1 = smov 128   ;;  %s792_s25 = smov 8  }
  0x24   :  { %27 = dma.hbm_to_vmem [thread:$0]  %s924_s0, 512, %s22_s16, [#allocation3], %s791_s1, %s791_s1, %s792_s25  }
  0x25   :  { %s793_s28 = smov [#allocation7]   ;;  %s794_s30 = smov [#allocation8]  }
  0x26   :  { %s47_s29 = sshll.u32 %s793_s28, 4  ;;  %s61_s8 = sshll.u32 %s794_s30, 4  ;;  %s48_s29 = int_to_ptr.vmem [resolvable:$true] %s47_s29  ;;  %s863_s8 = int_to_ptr.vmem [resolvable:$true] %s61_s8 }
  0x27   :  { %s713_s13 = scalar_lea.hbm %s927_s3, 1024 }
  0x28   :  { %p714_p2 = scmp.ne.s32.totalorder %s927_s3, %s713_s13  ;;  %p717_p3 = scmp.lt.u32.totalorder %s713_s13, %s927_s3 }
  0x2a   :  { %p719_p4 = pnand %p717_p3, %p714_p2 }
  0x2c   :  { %722 = shalt.err (!%p719_p4)
}
  0x2d   :  { %s723_s0 = scalar_lea.vmem %s48_s29, 1024  ;;  %p728_p6 = scmp.lt.s32.totalorder %s48_s29, %s48_s29 }
  0x2e   :  { %p724_p5 = scmp.ne.s32.totalorder %s48_s29, %s723_s0  ;;  %p729_p7 = scmp.lt.s32.totalorder %s723_s0, %s723_s0 }
  0x30   :  { %p730_p8 = por %p729_p7, %p728_p6 }
  0x32   :  { %p731_p9 = pnand %p730_p8, %p724_p5 }
  0x34   :  { %734 = shalt.err (!%p731_p9)
}
  0x35   :  { %53 = dma.hbm_to_vmem [thread:$0]  %s927_s3, 1024, %s48_s29, [#allocation6], %s788_s11, %s788_s11, %s789_s12  }
  0x36   :  { %s735_s22 = scalar_lea.hbm %s929_s5, 1024 }
  0x37   :  { %p736_p10 = scmp.ne.s32.totalorder %s929_s5, %s735_s22  ;;  %p739_p11 = scmp.lt.u32.totalorder %s735_s22, %s929_s5 }
  0x39   :  { %p741_p12 = pnand %p739_p11, %p736_p10 }
  0x3b   :  { %744 = shalt.err (!%p741_p12)
}
  0x3c   :  { %s745_s26 = scalar_lea.vmem %s863_s8, 1024  ;;  %p750_p0 = scmp.lt.s32.totalorder %s863_s8, %s863_s8 }
  0x3d   :  { %p746_p13 = scmp.ne.s32.totalorder %s863_s8, %s745_s26  ;;  %p751_p1 = scmp.lt.s32.totalorder %s745_s26, %s745_s26 }
  0x3f   :  { %p752_p2 = por %p751_p1, %p750_p0 }
  0x41   :  { %p753_p3 = pnand %p752_p2, %p746_p13 }
  0x43   :  { %756 = shalt.err (!%p753_p3)
}
  0x44   :  { %67 = dma.hbm_to_vmem [thread:$0]  %s929_s5, 1024, %s863_s8, [#allocation9], %s788_s11, %s788_s11, %s789_s12  }
  0x45   :  { %779 = dma.done.wait [#allocation3], 512  }
  0x46   :  { %780 = vsyncadd [#allocation3], 4294966784 }
  0x47   :  { %781 = dma.done.wait [#allocation6], 2048  }
  0x48   :  { %782 = vsyncadd [#allocation6], 4294965248 }
  0x49   :  { %783 = dma.done.wait [#allocation9], 1024  }
  0x4a   :  { %784 = vsyncadd [#allocation9], 4294966272  ;;  %v645_v0 = vld [vmem:[#allocation5] sm:$0xff]   ;;  %v646_v1 = vld [vmem:[#allocation5 + $0x8] sm:$0xff]  }
  0x4b   :  { %576 = vmatprep.subr.bf16.mxu0 %v645_v0  ;;  %v647_v2 = vld [vmem:[#allocation5 + $0x10] sm:$0xff]   ;;  %v648_v3 = vld [vmem:[#allocation5 + $0x18] sm:$0xff]   ;;  %v83_v4 = vld [vmem:[#allocation2] sm:$0xff] }
  0x4c   :  { %577 = vmatpush3.bf16.msra.mxu0 %v645_v0  ;;  %v84_v5 = vld [vmem:[#allocation2 + $0x8] sm:$0xff]  ;;  %v653_v7 = vld [vmem:[#allocation7] sm:$0xff]   ;;  %v655_v10 = vld [vmem:[#allocation7 + $0x10] sm:$0xff]  }
  0x4d   :  { %578 = vmatprep.subr.bf16.mxu0 %v646_v1  ;;  %v87_v6 = vpack.c.bf16 %v84_v5, %v83_v4  ;;  %v654_v8 = vld [vmem:[#allocation7 + $0x8] sm:$0xff]   ;;  %v649_v9 = vld [vmem:[#allocation5 + $0x20] sm:$0xff]   ;;  %596 = vmatprep.subr.bf16.mxu1 %v653_v7  ;;  %v656_v12 = vld [vmem:[#allocation7 + $0x18] sm:$0xff]  }
  0x4e   :  { %597 = vmatpush3.bf16.msra.mxu1 %v653_v7  ;;  %v650_v11 = vld [vmem:[#allocation5 + $0x28] sm:$0xff]   ;;  %v651_v13 = vld [vmem:[#allocation5 + $0x30] sm:$0xff]   ;;  %v657_v14 = vld [vmem:[#allocation7 + $0x20] sm:$0xff]  }
  0x4f   :  { %592 = vmatprep.mubr.bf16.mxu0 %v87_v6  ;;  %598 = vmatprep.subr.bf16.mxu1 %v654_v8  ;;  %v652_v15 = vld [vmem:[#allocation5 + $0x38] sm:$0xff]   ;;  %v658_v16 = vld [vmem:[#allocation7 + $0x28] sm:$0xff]   ;;  %v85_v17 = vld [vmem:[#allocation2 + $0x10] sm:$0xff] }
  0x50   :  { %579 = vmatpush3.bf16.msra.mxu0 %v646_v1  ;;  %v86_v18 = vld [vmem:[#allocation2 + $0x18] sm:$0xff]  ;;  %v659_v20 = vld [vmem:[#allocation7 + $0x30] sm:$0xff]   ;;  %v661_v22 = vld [vmem:[#allocation8] sm:$0xff]  }
  0x51   :  { %580 = vmatprep.subr.bf16.mxu0 %v647_v2  ;;  %v88_v19 = vpack.c.bf16 %v86_v18, %v85_v17  ;;  %v660_v21 = vld [vmem:[#allocation7 + $0x38] sm:$0xff]   ;;  %v662_v23 = vld [vmem:[#allocation8 + $0x8] sm:$0xff]   ;;  %v663_v24 = vld [vmem:[#allocation8 + $0x10] sm:$0xff]  }
  0x52   :  { %599 = vmatpush3.bf16.msra.mxu1 %v654_v8  ;;  %v664_v25 = vld [vmem:[#allocation8 + $0x18] sm:$0xff]   ;;  %v665_v26 = vld [vmem:[#allocation8 + $0x20] sm:$0xff]   ;;  %v666_v27 = vld [vmem:[#allocation8 + $0x28] sm:$0xff]  }
  0x53   :  { %600 = vmatprep.subr.bf16.mxu1 %v655_v10  ;;  %v500_v28 = vld [vmem:[%s926_s2] ss:$0 sm:$0xff]  ;;  %v667_v43 = vld [vmem:[#allocation8 + $0x30] sm:$0xff]   ;;  %v668_v44 = vld [vmem:[#allocation8 + $0x38] sm:$0xff]  }
  0x54   :  { %581 = vmatpush3.bf16.msra.mxu0 %v647_v2  ;;  %v509_v45 = vld [vmem:[%s928_s4] ss:$0 sm:$0xff]  ;;  %s795_s4 = smov [#allocation10]  }
  0x55   :  { %582 = vmatprep.subr.bf16.mxu0 %v648_v3  ;;  %v518_v61 = vld [vmem:[%s930_s6] ss:$0 sm:$0xff]  ;;  %s486_s9 = sshll.u32 %s795_s4, 4  ;;  %s487_s9 = int_to_ptr.vmem [resolvable:$true] %s486_s9 }
  0x56   :  { %601 = vmatpush3.bf16.msra.mxu1 %v655_v10  ;;  %s757_s10 = scalar_lea.vmem %s487_s9, 256  ;;  %p762_p5 = scmp.lt.s32.totalorder %s487_s9, %s487_s9 }
  0x57   :  { %602 = vmatprep.subr.bf16.mxu1 %v656_v12  ;;  %p758_p4 = scmp.ne.s32.totalorder %s487_s9, %s757_s10  ;;  %p763_p6 = scmp.lt.s32.totalorder %s757_s10, %s757_s10 }
  0x58   :  { %583 = vmatpush3.bf16.msra.mxu0 %v648_v3 }
  0x59   :  { %584 = vmatprep.subr.bf16.mxu0 %v649_v9  ;;  %p764_p7 = por %p763_p6, %p762_p5 }
  0x5a   :  { %603 = vmatpush3.bf16.msra.mxu1 %v656_v12 }
  0x5b   :  { %604 = vmatprep.subr.bf16.mxu1 %v657_v14  ;;  %p765_p8 = pnand %p764_p7, %p758_p4 }
  0x5c   :  { %585 = vmatpush3.bf16.msra.mxu0 %v649_v9 }
  0x5d   :  { %586 = vmatprep.subr.bf16.mxu0 %v650_v11 }
  0x5e   :  { %605 = vmatpush3.bf16.msra.mxu1 %v657_v14 }
  0x5f   :  { %606 = vmatprep.subr.bf16.mxu1 %v658_v16 }
  0x60   :  { %587 = vmatpush3.bf16.msra.mxu0 %v650_v11 }
  0x61   :  { %588 = vmatprep.subr.bf16.mxu0 %v651_v13 }
  0x62   :  { %607 = vmatpush3.bf16.msra.mxu1 %v658_v16 }
  0x63   :  { %608 = vmatprep.subr.bf16.mxu1 %v659_v20 }
  0x64   :  { %589 = vmatpush3.bf16.msra.mxu0 %v651_v13 }
  0x65   :  { %590 = vmatprep.subr.bf16.mxu0 %v652_v15 }
  0x66   :  { %609 = vmatpush3.bf16.msra.mxu1 %v659_v20 }
  0x67   :  { %610 = vmatprep.subr.bf16.mxu1 %v660_v21 }
  0x68   :  { %591 = vmatpush3.bf16.msra.mxu0 %v652_v15 }
  0x69   :  { %616 = vmatprep.subr.bf16.mxu0 %v661_v22 }
  0x6a   :  { %611 = vmatpush3.bf16.msra.mxu1 %v660_v21 }
  0x6b   :  { %593 = vmatmul.mubr.bf16.vlgmr.msra.gmra.mrb[0].mxu0 %v88_v19 }
  0x6c   :  { %617 = vmatpush3.bf16.msra.mxu0 %v661_v22 }
  0x6d   :  { %618 = vmatprep.subr.bf16.mxu0 %v662_v23 }
  0x70   :  { %619 = vmatpush3.bf16.msra.mxu0 %v662_v23 }
  0x71   :  { %620 = vmatprep.subr.bf16.mxu0 %v663_v24 }
  0x74   :  { %621 = vmatpush3.bf16.msra.mxu0 %v663_v24 }
  0x75   :  { %622 = vmatprep.subr.bf16.mxu0 %v664_v25 }
  0x78   :  { %623 = vmatpush3.bf16.msra.mxu0 %v664_v25 }
  0x79   :  { %624 = vmatprep.subr.bf16.mxu0 %v665_v26 }
  0x7c   :  { %625 = vmatpush3.bf16.msra.mxu0 %v665_v26 }
  0x7d   :  { %626 = vmatprep.subr.bf16.mxu0 %v666_v27 }
  0x80   :  { %627 = vmatpush3.bf16.msra.mxu0 %v666_v27 }
  0x81   :  { %628 = vmatprep.subr.bf16.mxu0 %v667_v43 }
  0x84   :  { %629 = vmatpush3.bf16.msra.mxu0 %v667_v43 }
  0x85   :  { %630 = vmatprep.subr.bf16.mxu0 %v668_v44 }
  0x88   :  { %631 = vmatpush3.bf16.msra.mxu0 %v668_v44 }
 0x13e   :  { %v594_v29 = vpop.f32.mrb[0].mxu0 }
 0x13f   :  { %v203_v30 = vadd.f32 %v594_v29, %v500_v28  ;;  %v194_v31 = vpop.f32.mrb[1].mxu0 }
 0x140   :  { %v195_v32 = vadd.f32 %v500_v28, %v194_v31  ;;  %v595_v33 = vpop.f32.mrb[2].mxu0 }
 0x141   :  { %v206_v34 = vadd.f32 %v595_v33, %v500_v28  ;;  %v197_v35 = vpop.f32.mrb[3].mxu0  ;;  %v211_v37 = vmax.f32 %v203_v30, 0.0 }
 0x142   :  { %v198_v36 = vadd.f32 %v500_v28, %v197_v35  ;;  %v209_v39 = vmax.f32 %v195_v32, 0.0 }
 0x143   :  { %v212_v38 = vmax.f32 %v206_v34, 0.0 }
 0x144   :  { %v210_v40 = vmax.f32 %v198_v36, 0.0 }
 0x145   :  { %v214_v41 = vpack.c.bf16 %v212_v38, %v211_v37 }
 0x146   :  { %v213_v42 = vpack.c.bf16 %v210_v40, %v209_v39 }
 0x148   :  { %612 = vmatprep.mubr.bf16.mxu1 %v213_v42 }
 0x149   :  { %613 = vmatmul.mubr.bf16.vlgmr.msra.gmra.mrb[0].mxu1 %v214_v41 }
 0x21c   :  { %v614_v46 = vpop.f32.mrb[0].mxu1 }
 0x21d   :  { %v329_v47 = vadd.f32 %v614_v46, %v509_v45  ;;  %v320_v48 = vpop.f32.mrb[1].mxu1 }
 0x21e   :  { %v321_v49 = vadd.f32 %v509_v45, %v320_v48  ;;  %v615_v50 = vpop.f32.mrb[2].mxu1 }
 0x21f   :  { %v332_v51 = vadd.f32 %v615_v50, %v509_v45  ;;  %v323_v52 = vpop.f32.mrb[3].mxu1  ;;  %v337_v54 = vmax.f32 %v329_v47, 0.0 }
 0x220   :  { %v324_v53 = vadd.f32 %v509_v45, %v323_v52  ;;  %v335_v56 = vmax.f32 %v321_v49, 0.0 }
 0x221   :  { %v338_v55 = vmax.f32 %v332_v51, 0.0 }
 0x222   :  { %v336_v57 = vmax.f32 %v324_v53, 0.0 }
 0x223   :  { %v340_v58 = vpack.c.bf16 %v338_v55, %v337_v54 }
 0x224   :  { %v339_v59 = vpack.c.bf16 %v336_v57, %v335_v56 }
 0x226   :  { %632 = vmatprep.mubr.bf16.mxu0 %v339_v59 }
 0x227   :  { %633 = vmatmul.mubr.bf16.vlgmr.msra.gmra.mrb[4].mxu0 %v340_v58 }
 0x2fa   :  { %v634_v60 = vpop.f32.mrb[4].mxu0 }
 0x2fb   :  { %v446_v62 = vpop.f32.mrb[5].mxu0  ;;  %v455_v0 = vadd.f32 %v634_v60, %v518_v61 }
 0x2fc   :  { %v635_v63 = vpop.f32.mrb[6].mxu0  ;;  %v447_v3 = vadd.f32 %v518_v61, %v446_v62 }
 0x2fd   :  { %v458_v1 = vadd.f32 %v635_v63, %v518_v61  ;;  %v449_v2 = vpop.f32.mrb[7].mxu0 }
 0x2fe   :  { %v450_v4 = vadd.f32 %v518_v61, %v449_v2 }
 0x2ff   :  { %v543_v5 = vpack.c.bf16 %v458_v1, %v455_v0 }
 0x300   :  { %v538_v6 = vpack.c.bf16 %v450_v4, %v447_v3 }
 0x301   :  { %545 = vst [vmem:[#allocation10 + $0x8] sm:$0xff] %v543_v5  }
 0x302   :  { %539 = vst [vmem:[#allocation10] sm:$0xff] %v538_v6  }
 0x303   :  { %768 = shalt.err (!%p765_p8)
}
 0x304   :  { %s769_s14 = scalar_lea.hbm %s931_s7, 256 }
 0x305   :  { %p770_p9 = scmp.ne.s32.totalorder %s931_s7, %s769_s14  ;;  %p773_p10 = scmp.lt.u32.totalorder %s769_s14, %s931_s7 }
 0x307   :  { %p775_p11 = pnand %p773_p10, %p770_p9 }
 0x309   :  { %778 = shalt.err (!%p775_p11)
}
 0x30a   :  { %492 = dma.vmem_to_hbm [thread:$0]  %s487_s9, 256, %s931_s7, [#allocation4], %s788_s11, %s788_s11, %s789_s12  }
 0x30b   :  { %785 = dma.done.wait [#allocation4], 256  }
 0x30c   :  { %786 = vsyncadd [#allocation4], 4294967040 }
 0x30d   :  { %496 = vsyncpa [#allocation3], 1 }
 0x30e   :  { %497 = vsyncpa [#allocation6], 1 }
 0x30f   :  { %498 = vsyncpa [#allocation9], 1 }
 0x310   :  { %499 = vsyncpa [#allocation4], 1 }

</bundles_post_ra>
